<compile_context>
chip_gen: v5e
topology: v5e:2x2
jax: 0.10.0
libtpu: 0.0.40
codegen_flags: <defaults>
</compile_context>

<pallas_src>
import functools

import jax
import jax.numpy as jnp
import numpy as np
from jax import lax
from jax.experimental import pallas as pl
from jax.experimental.pallas import tpu as pltpu

EMBED_D = 512                     # hardcoded in PatchEmbed.proj_d
EMBED_V = 64                      # hardcoded in PatchEmbed.proj_v
T_INPUT_DIM = EMBED_D + EMBED_V   # 576; required for the concat with cls/pos

# Contract lhs dim 0 with rhs dim 0  ==  dot(lhs.T, rhs)  (transposed-LHS).
_TRANS_LHS_DIMS = (((0,), (0,)), ((), ()))


def _embed_kernel(d_ref, v_ref, lcpos_ref, clspos_ref,
                  wd_ref, bdpos_ref, wv_ref, bvpos_ref, out_ref, *, bb, n):
    """One grid step over `bb` batch elements.

    d_ref, v_ref : (bb, pd, n)  bf16, native channel-major layout
    lcpos_ref    : (bb, 2, 576) f32, [l, c] (or [c, ctxt]) rows with +pos folded
    clspos_ref   : (1, 576)     f32, cls_token + pos_embedding
    wd/wv        : (pd, 512)/(pd, 64)  bf16
    bdpos/bvpos  : (1, 512)/(1, 64)    f32, Linear bias + pos slice folded
    out_ref      : (bb, n + 3, 576)    f32
    """
    wd = wd_ref[...]
    wv = wv_ref[...]
    bd = bdpos_ref[...]
    bv = bvpos_ref[...]

    # Whole-block stores for the cls row and the trailing [l, c] rows.
    out_ref[:, pl.ds(0, 1), :] = jnp.broadcast_to(
        clspos_ref[...].reshape(1, 1, T_INPUT_DIM), (bb, 1, T_INPUT_DIM))
    out_ref[:, pl.ds(n + 1, 2), :] = lcpos_ref[...]

    # Per-batch transposed-LHS dots (contract the channel/pd axis) with f32
    # accumulation on the MXU; bias+pos adds stay in f32.  bb is small and
    # static.  Results are stored straight into their lane ranges: [0:512]
    # lane-dense (4x128 unmasked stores), [512:576] a single 64-lane store.
    for bi in range(bb):
        dm = lax.dot_general(d_ref[bi], wd, dimension_numbers=_TRANS_LHS_DIMS,
                             preferred_element_type=jnp.float32) + bd
        vm = lax.dot_general(v_ref[bi], wv, dimension_numbers=_TRANS_LHS_DIMS,
                             preferred_element_type=jnp.float32) + bv
        out_ref[bi, pl.ds(1, n), pl.ds(0, EMBED_D)] = dm
        out_ref[bi, pl.ds(1, n), pl.ds(EMBED_D, EMBED_V)] = vm


def _batch_blocking(b, max_bb):
    """Return (batch_block, grid_steps).

    Guarantees >=2 grid steps whenever b > 1 (pipeline overlap + v7x second
    TensorCore) and minimizes padding: steps = max(2, ceil(b/max_bb)),
    bb = ceil(b/steps).  Caller zero-pads the batch up to bb*steps.
    """
    if b <= 1:
        return 1, 1
    steps = max(2, -(-b // max_bb))
    bb = -(-b // steps)
    return bb, steps


def transformer_forward(d, v, l, c, params, ctxt=None, *, max_bb=16):
    b, ch, H, W = d.shape
    n = H * W
    pd = ch  # patch_dim with patch_size == 1 (the only shape-consistent case)
    seq_len = n + 3

    # Free reshape of the native NCHW layout; the rearrange/transpose of the
    # reference PatchEmbed happens *inside* the kernel as a transposed-LHS
    # contraction, so activations make exactly one HBM->VMEM trip.
    # TODO(synk): in the full model, emit d/v in bf16 from the producing layer
    # so these casts fuse upstream instead of being standalone passes.
    d_r = d.reshape(b, pd, n).astype(jnp.bfloat16)
    v_r = v.reshape(b, pd, n).astype(jnp.bfloat16)

    pos = params["pos_embedding"].reshape(1, T_INPUT_DIM).astype(jnp.float32)
    cls_pos = params["cls_token"].reshape(1, T_INPUT_DIM) + pos
    # Fold pos into the biases / trailing rows (no per-step broadcast re-adds,
    # one fewer resident VMEM buffer).
    bd_pos = params["bd"].reshape(1, EMBED_D) + pos[:, :EMBED_D]
    bv_pos = params["bv"].reshape(1, EMBED_V) + pos[:, EMBED_D:]
    wd = params["wd"].astype(jnp.bfloat16)
    wv = params["wv"].astype(jnp.bfloat16)

    # Trailing two sequence rows: (l, c) normally, (c, ctxt) when ctxt given.
    rows = (c, ctxt) if ctxt is not None else (l, c)
    lc_pos = jnp.stack(rows, axis=1) + pos[None]          # (b, 2, 576) f32

    bb, steps = _batch_blocking(b, max_bb)
    b_pad = bb * steps
    if b_pad != b:
        extra = b_pad - b
        d_r = jnp.pad(d_r, ((0, extra), (0, 0), (0, 0)))
        v_r = jnp.pad(v_r, ((0, extra), (0, 0), (0, 0)))
        lc_pos = jnp.pad(lc_pos, ((0, extra), (0, 0), (0, 0)))

    flops = 2 * b * n * pd * (EMBED_D + EMBED_V)
    bytes_accessed = (2 * (2 * b_pad * n * pd)                 # bf16 d, v
                      + 2 * pd * (EMBED_D + EMBED_V)           # bf16 weights
                      + 4 * (b_pad * 2 * T_INPUT_DIM           # lc rows
                             + 2 * T_INPUT_DIM                 # cls / biases
                             + EMBED_D + EMBED_V
                             + b_pad * seq_len * T_INPUT_DIM)) # output

    kernel = functools.partial(_embed_kernel, bb=bb, n=n)

    # TODO(synk): if the downstream encoder consumes bf16, emit the output in
    # bf16 (out_shape dtype) to halve writeback bytes.
    out = pl.pallas_call(
        kernel,
        out_shape=jax.ShapeDtypeStruct((b_pad, seq_len, T_INPUT_DIM),
                                       jnp.float32),
        grid_spec=pltpu.PrefetchScalarGridSpec(
            num_scalar_prefetch=0,
            grid=(steps,),
            in_specs=[
                pl.BlockSpec((bb, pd, n), lambda i: (i, 0, 0)),           # d
                pl.BlockSpec((bb, pd, n), lambda i: (i, 0, 0)),           # v
                pl.BlockSpec((bb, 2, T_INPUT_DIM), lambda i: (i, 0, 0)),  # [l,c]+pos
                pl.BlockSpec((1, T_INPUT_DIM), lambda i: (0, 0)),         # cls+pos
                pl.BlockSpec((pd, EMBED_D), lambda i: (0, 0)),            # proj_d W
                pl.BlockSpec((1, EMBED_D), lambda i: (0, 0)),             # bd+pos_d
                pl.BlockSpec((pd, EMBED_V), lambda i: (0, 0)),            # proj_v W
                pl.BlockSpec((1, EMBED_V), lambda i: (0, 0)),             # bv+pos_v
            ],
            out_specs=pl.BlockSpec((bb, seq_len, T_INPUT_DIM),
                                   lambda i: (i, 0, 0)),
        ),
        compiler_params=pltpu.CompilerParams(
            dimension_semantics=("parallel",),
            # Headroom above the default scoped limit for larger bb / f32
            # paths; still well under every generation's physical VMEM.
            vmem_limit_bytes=48 * 1024 * 1024),
        cost_estimate=pl.CostEstimate(flops=int(flops), transcendentals=0,
                                      bytes_accessed=int(bytes_accessed)),
    )(d_r, v_r, lc_pos, cls_pos, wd, bd_pos, wv, bv_pos)

    return out[:b] if b_pad != b else out


def reference_forward(d, v, l, c, params):
    # Pure-JAX reference mirroring the PyTorch forward semantics (f32).
    b, ch, H, W = d.shape
    n = H * W
    d_tok = jnp.transpose(d, (0, 2, 3, 1)).reshape(b, n, ch)
    v_tok = jnp.transpose(v, (0, 2, 3, 1)).reshape(b, n, ch)
    dm = d_tok @ params["wd"] + params["bd"]
    vm = v_tok @ params["wv"] + params["bv"]
    x = jnp.concatenate([dm, vm], axis=-1)
    cls = jnp.broadcast_to(params["cls_token"], (b, 1, T_INPUT_DIM))
    x = jnp.concatenate([cls, x, l[:, None, :], c[:, None, :]], axis=1)
    return x + params["pos_embedding"]


def init_params(key, patch_dim):
    ks = jax.random.split(key, 6)
    return {
        "wd": jax.random.normal(ks[0], (patch_dim, EMBED_D), jnp.float32) * 0.02,
        "bd": jax.random.normal(ks[1], (EMBED_D,), jnp.float32) * 0.02,
        "wv": jax.random.normal(ks[2], (patch_dim, EMBED_V), jnp.float32) * 0.02,
        "bv": jax.random.normal(ks[3], (EMBED_V,), jnp.float32) * 0.02,
        "cls_token": jax.random.normal(ks[4], (1, 1, T_INPUT_DIM), jnp.float32),
        "pos_embedding": jax.random.normal(ks[5], (1, 1, T_INPUT_DIM), jnp.float32),
    }


if __name__ == "__main__":
    # Small shapes: patch_dim = 2*in_channels = 8 channels (subject+object
    # feature concat upstream), spatial 4x4 -> 16 tokens, batch 2 -> bb=1,
    # grid=(2,).
    key = jax.random.PRNGKey(0)
    k_d, k_v, k_l, k_c, k_p = jax.random.split(key, 5)

    b, ch, H, W = 2, 8, 4, 4
    d = jax.random.normal(k_d, (b, ch, H, W), jnp.float32)
    v = jax.random.normal(k_v, (b, ch, H, W), jnp.float32)
    l = jax.random.normal(k_l, (b, T_INPUT_DIM), jnp.float32)
    c = jax.random.normal(k_c, (b, T_INPUT_DIM), jnp.float32)
    params = init_params(k_p, ch)

    out = jax.block_until_ready(transformer_forward(d, v, l, c, params))
    ref = jax.block_until_ready(reference_forward(d, v, l, c, params))

    # bf16 activations/weights with f32 accumulation vs. the pure-f32
    # reference -> loosened tolerance.
    np.testing.assert_allclose(np.asarray(out), np.asarray(ref),
                               rtol=1e-2, atol=1e-2)
    assert out.shape == (b, H * W + 3, T_INPUT_DIM)
    print("KERNEL_OK")
</pallas_src>

<mosaic_0001>
module attributes {stable_mosaic.version = 11 : i64} {
  func.func @_embed_kernel(%arg0: i32, %arg1: memref<1x8x16xbf16, #tpu.memory_space<vmem>>, %arg2: memref<1x8x16xbf16, #tpu.memory_space<vmem>>, %arg3: memref<1x2x576xf32, #tpu.memory_space<vmem>>, %arg4: memref<1x576xf32, #tpu.memory_space<vmem>>, %arg5: memref<8x512xbf16, #tpu.memory_space<vmem>>, %arg6: memref<1x512xf32, #tpu.memory_space<vmem>>, %arg7: memref<8x64xbf16, #tpu.memory_space<vmem>>, %arg8: memref<1x64xf32, #tpu.memory_space<vmem>>, %arg9: memref<1x19x576xf32, #tpu.memory_space<vmem>>) attributes {dimension_semantics = [#tpu.dimension_semantics<parallel>], iteration_bounds = array<i64: 2>, scalar_prefetch = 0 : i64, scratch_operands = 0 : i64, tpu.core_type = #tpu.core_type<tc>, window_params = [{transform_indices = @transform_0, window_bounds = array<i64: 1, 8, 16>}, {transform_indices = @transform_1, window_bounds = array<i64: 1, 8, 16>}, {transform_indices = @transform_2, window_bounds = array<i64: 1, 2, 576>}, {pipeline_mode = #tpu.pipeline_mode<synchronous>, transform_indices = @transform_3, window_bounds = array<i64: 1, 576>}, {pipeline_mode = #tpu.pipeline_mode<synchronous>, transform_indices = @transform_4, window_bounds = array<i64: 8, 512>}, {pipeline_mode = #tpu.pipeline_mode<synchronous>, transform_indices = @transform_5, window_bounds = array<i64: 1, 512>}, {pipeline_mode = #tpu.pipeline_mode<synchronous>, transform_indices = @transform_6, window_bounds = array<i64: 8, 64>}, {pipeline_mode = #tpu.pipeline_mode<synchronous>, transform_indices = @transform_7, window_bounds = array<i64: 1, 64>}, {transform_indices = @transform_8, window_bounds = array<i64: 1, 19, 576>}]} {
    %c0 = arith.constant 0 : index
    %c0_0 = arith.constant 0 : index
    %0 = vector.load %arg5[%c0, %c0_0] : memref<8x512xbf16, #tpu.memory_space<vmem>>, vector<8x512xbf16>
    %c0_1 = arith.constant 0 : index
    %c0_2 = arith.constant 0 : index
    %1 = vector.load %arg7[%c0_1, %c0_2] : memref<8x64xbf16, #tpu.memory_space<vmem>>, vector<8x64xbf16>
    %c0_3 = arith.constant 0 : index
    %c0_4 = arith.constant 0 : index
    %2 = vector.load %arg6[%c0_3, %c0_4] : memref<1x512xf32, #tpu.memory_space<vmem>>, vector<1x512xf32>
    %c0_5 = arith.constant 0 : index
    %c0_6 = arith.constant 0 : index
    %3 = vector.load %arg8[%c0_5, %c0_6] : memref<1x64xf32, #tpu.memory_space<vmem>>, vector<1x64xf32>
    %c0_7 = arith.constant 0 : index
    %c0_8 = arith.constant 0 : index
    %4 = vector.load %arg4[%c0_7, %c0_8] : memref<1x576xf32, #tpu.memory_space<vmem>>, vector<1x576xf32>
    %5 = vector.shape_cast %4 : vector<1x576xf32> to vector<1x1x576xf32>
    %c0_9 = arith.constant 0 : index
    %c0_10 = arith.constant 0 : index
    %c0_11 = arith.constant 0 : index
    %6 = vector.load %arg9[%c0_9, %c0_10, %c0_11] : memref<1x19x576xf32, #tpu.memory_space<vmem>>, vector<1x1x576xf32>
    tpu.vector_store %arg9[%c0_9, %c0_10, %c0_11], %5 {strides = array<i32>} : memref<1x19x576xf32, #tpu.memory_space<vmem>>, vector<1x1x576xf32>,
    %c0_12 = arith.constant 0 : index
    %c0_13 = arith.constant 0 : index
    %c0_14 = arith.constant 0 : index
    %7 = vector.load %arg3[%c0_12, %c0_13, %c0_14] : memref<1x2x576xf32, #tpu.memory_space<vmem>>, vector<1x2x576xf32>
    %c0_15 = arith.constant 0 : index
    %c17 = arith.constant 17 : index
    %c0_16 = arith.constant 0 : index
    %8 = vector.load %arg9[%c0_15, %c17, %c0_16] : memref<1x19x576xf32, #tpu.memory_space<vmem>>, vector<1x2x576xf32>
    tpu.vector_store %arg9[%c0_15, %c17, %c0_16], %7 {strides = array<i32>} : memref<1x19x576xf32, #tpu.memory_space<vmem>>, vector<1x2x576xf32>,
    %c0_17 = arith.constant 0 : index
    %c0_18 = arith.constant 0 : index
    %c0_19 = arith.constant 0 : index
    %9 = vector.load %arg1[%c0_17, %c0_18, %c0_19] : memref<1x8x16xbf16, #tpu.memory_space<vmem>>, vector<1x8x16xbf16>
    %10 = vector.shape_cast %9 : vector<1x8x16xbf16> to vector<8x16xbf16>
    %cst = arith.constant dense<0.000000e+00> : vector<16x512xf32>
    %11 = tpu.matmul %10, %0, %cst {dimension_numbers = #tpu.dot_dimension_numbers<[0], [0], [1], [1], [0, 1, 1, 1], [], []>} : vector<8x16xbf16>, vector<8x512xbf16>, vector<16x512xf32> -> vector<16x512xf32>
    %12 = vector.broadcast %2 : vector<1x512xf32> to vector<16x512xf32>
    %13 = arith.addf %11, %12 : vector<16x512xf32>
    %c0_20 = arith.constant 0 : index
    %c0_21 = arith.constant 0 : index
    %c0_22 = arith.constant 0 : index
    %14 = vector.load %arg2[%c0_20, %c0_21, %c0_22] : memref<1x8x16xbf16, #tpu.memory_space<vmem>>, vector<1x8x16xbf16>
    %15 = vector.shape_cast %14 : vector<1x8x16xbf16> to vector<8x16xbf16>
    %cst_23 = arith.constant dense<0.000000e+00> : vector<16x64xf32>
    %16 = tpu.matmul %15, %1, %cst_23 {dimension_numbers = #tpu.dot_dimension_numbers<[0], [0], [1], [1], [0, 1, 1, 1], [], []>} : vector<8x16xbf16>, vector<8x64xbf16>, vector<16x64xf32> -> vector<16x64xf32>
    %17 = vector.broadcast %3 : vector<1x64xf32> to vector<16x64xf32>
    %18 = arith.addf %16, %17 : vector<16x64xf32>
    %c0_24 = arith.constant 0 : index
    %c1 = arith.constant 1 : index
    %c0_25 = arith.constant 0 : index
    %19 = vector.load %arg9[%c0_24, %c1, %c0_25] : memref<1x19x576xf32, #tpu.memory_space<vmem>>, vector<1x16x512xf32>
    %20 = vector.shape_cast %19 : vector<1x16x512xf32> to vector<16x512xf32>
    %21 = vector.shape_cast %13 : vector<16x512xf32> to vector<1x16x512xf32>
    tpu.vector_store %arg9[%c0_24, %c1, %c0_25], %21 {strides = array<i32>} : memref<1x19x576xf32, #tpu.memory_space<vmem>>, vector<1x16x512xf32>,
    %c0_26 = arith.constant 0 : index
    %c1_27 = arith.constant 1 : index
    %c512 = arith.constant 512 : index
    %22 = vector.load %arg9[%c0_26, %c1_27, %c512] : memref<1x19x576xf32, #tpu.memory_space<vmem>>, vector<1x16x64xf32>
    %23 = vector.shape_cast %22 : vector<1x16x64xf32> to vector<16x64xf32>
    %24 = vector.shape_cast %18 : vector<16x64xf32> to vector<1x16x64xf32>
    tpu.vector_store %arg9[%c0_26, %c1_27, %c512], %24 {strides = array<i32>} : memref<1x19x576xf32, #tpu.memory_space<vmem>>, vector<1x16x64xf32>,
    return
  }
  func.func @transform_0(%arg0: i32) -> (i32, i32, i32) {
    %c0_i32 = arith.constant 0 : i32
    %c0_i32_0 = arith.constant 0 : i32
    %c0_i32_1 = arith.constant 0 : i32
    return %arg0, %c0_i32, %c0_i32_0 : i32, i32, i32
  }
  func.func @transform_1(%arg0: i32) -> (i32, i32, i32) {
    %c0_i32 = arith.constant 0 : i32
    %c0_i32_0 = arith.constant 0 : i32
    %c0_i32_1 = arith.constant 0 : i32
    return %arg0, %c0_i32, %c0_i32_0 : i32, i32, i32
  }
  func.func @transform_2(%arg0: i32) -> (i32, i32, i32) {
    %c0_i32 = arith.constant 0 : i32
    %c0_i32_0 = arith.constant 0 : i32
    %c0_i32_1 = arith.constant 0 : i32
    return %arg0, %c0_i32, %c0_i32_0 : i32, i32, i32
  }
  func.func @transform_3(%arg0: i32) -> (i32, i32) {
    %c0_i32 = arith.constant 0 : i32
    %c0_i32_0 = arith.constant 0 : i32
    %c0_i32_1 = arith.constant 0 : i32
    return %c0_i32, %c0_i32_0 : i32, i32
  }
  func.func @transform_4(%arg0: i32) -> (i32, i32) {
    %c0_i32 = arith.constant 0 : i32
    %c0_i32_0 = arith.constant 0 : i32
    %c0_i32_1 = arith.constant 0 : i32
    return %c0_i32, %c0_i32_0 : i32, i32
  }
  func.func @transform_5(%arg0: i32) -> (i32, i32) {
    %c0_i32 = arith.constant 0 : i32
    %c0_i32_0 = arith.constant 0 : i32
    %c0_i32_1 = arith.constant 0 : i32
    return %c0_i32, %c0_i32_0 : i32, i32
  }
  func.func @transform_6(%arg0: i32) -> (i32, i32) {
    %c0_i32 = arith.constant 0 : i32
    %c0_i32_0 = arith.constant 0 : i32
    %c0_i32_1 = arith.constant 0 : i32
    return %c0_i32, %c0_i32_0 : i32, i32
  }
  func.func @transform_7(%arg0: i32) -> (i32, i32) {
    %c0_i32 = arith.constant 0 : i32
    %c0_i32_0 = arith.constant 0 : i32
    %c0_i32_1 = arith.constant 0 : i32
    return %c0_i32, %c0_i32_0 : i32, i32
  }
  func.func @transform_8(%arg0: i32) -> (i32, i32, i32) {
    %c0_i32 = arith.constant 0 : i32
    %c0_i32_0 = arith.constant 0 : i32
    %c0_i32_1 = arith.constant 0 : i32
    return %arg0, %c0_i32, %c0_i32_0 : i32, i32, i32
  }
}

</mosaic_0001>

<bundles_post_ra>
// kernel: tpu_custom_call.1
= control target key start
LH: loop header
LB: loop body
LE: loop exit
PB: predicated region body
PF: predicated region fallthrough
CT: control target
= control target key end

     0   :  { %s1442_s0 = inlined_call_operand.hbm [shape: bf16[2,8,16], index: 0, kind: input, shape index: {}]   ;;  %s1443_s1 = inlined_call_operand.hbm [shape: bf16[2,8,16], index: 1, kind: input, shape index: {}]   ;;  %s1444_s2 = inlined_call_operand.hbm [shape: f32[2,2,576], index: 2, kind: input, shape index: {}]   ;;  %s1445_s3 = inlined_call_operand.hbm [shape: f32[1,576], index: 3, kind: input, shape index: {}]   ;;  %s1446_s4 = inlined_call_operand.hbm [shape: bf16[8,512], index: 4, kind: input, shape index: {}]   ;;  %s1447_s5 = inlined_call_operand.vmem [shape: f32[1,512], index: 5, kind: input, shape index: {}]   ;;  %s1448_s6 = inlined_call_operand.hbm [shape: bf16[8,64], index: 6, kind: input, shape index: {}]   ;;  %s1449_s7 = inlined_call_operand.vmem [shape: f32[1,64], index: 7, kind: input, shape index: {}]   ;;  %s1450_s8 = inlined_call_operand.vmem [shape: f32[2,19,576], index: 8, kind: output, shape index: {}]  }
   0x1   :  { %1454 = sst [smem:[#allocation18_spill]] %s1443_s1 }
   0x2   :  { %1455 = sst [smem:[#allocation19_spill]] %s1445_s3 }
   0x3   :  { %1456 = sst [smem:[#allocation20_spill]] %s1446_s4 }
   0x4   :  { %13 = vsyncpa [#allocation3], 0 }
   0x5   :  { %15 = vsyncpa [#allocation3 + $0x1], 0 }
   0x6   :  { %16 = vsyncpa [#allocation5], 0 }
   0x7   :  { %18 = vsyncpa [#allocation5 + $0x1], 0 }
   0x8   :  { %19 = vsyncpa [#allocation8], 0 }
   0x9   :  { %20 = vsyncpa [#allocation11], 0  ;;  %s1220_s27 = smov 0   ;;  %s1222_s28 = smov 0  }
   0xa   :  { %s1224_s29 = smov 0   ;;  %s1226_s30 = smov 0  }
   0xb LB: > { %1457 = sst [smem:[#allocation16_spill]] %s1166_s29  ;;  %s1239_s9 = sadd.s32 4294967295, %s1170_s30   ;;  %s1170_s30 = sphi %s1226_s30, %s1472_s30   ;;  %s1166_s29 = sphi %s1224_s29, %s1469_s29   ;;  %s1162_s28 = sphi %s1222_s28, %s1471_s28   ;;  %s1158_s27 = sphi %s1220_s27, %s1470_s27  }
   0xc   : > { %p46_p0 = scmp.ne.s32.totalorder %s1162_s28, %s1158_s27  ;;  %p47_p1 = scmp.eq.s32.totalorder %s1239_s9, 0 }
   0xd   : > { %p834_p2 = scmp.ge.s32.totalorder %s1170_s30, 1  ;;  %p240_p3 = scmp.lt.s32.totalorder %s1170_s30, 3 }
   0xe   : > { %p1247_p4 = por %p47_p1, %p46_p0  ;;  %s1459_s3 = sld [smem:[#allocation19_spill]] }
   0xf   : > { %p1254_p5 = pnand %p834_p2, %p240_p3  ;;  %s1172_s15 = smov [#allocation7]  }
  0x10   : > { %s254_s16 = sshll.u32 %s1172_s15, 4  ;;  %s1267_s18 = sadd.s32 1, %s1170_s30   ;;  %s255_s16 = int_to_ptr.vmem [resolvable:$true] %s254_s16 }
  0x11   : > { %p880_p6 = pneg %p1254_p5  ;;  %s33_s19 = sadd.s32 1, %s1166_s29 }
  0x12   : > { %s30_s20 = ssub.s32 %s1170_s30, %s1267_s18  ;;  %p40_p9 = scmp.ne.s32.totalorder %s1166_s29, %s1162_s28 }
  0x13   : > { %p1262_p7 = pnand %p880_p6, %p47_p1  ;;  %p31_p8 = scmp.eq.s32.totalorder %s30_s20, 0 }
  0x14   : > { %s252_s13 = sshll.u32 %s1459_s3, 4  ;;  %p41_p10 = scmp.eq.s32.totalorder %s1170_s30, 0  ;;  %s253_s13 = int_to_ptr.hbm [resolvable:$true] %s252_s13 }
  0x15   : > { %883 = dma.hbm_to_vmem [thread:$0]  (!%p1262_p7), %s253_s13, 80, %s255_s16, [#allocation8]  }
  0x16   : > { %p903_p11 = scmp.lt.s32.totalorder %s1170_s30, 2  ;;  %p42_p12 = por %p41_p10, %p40_p9 }
  0x17   : > { %s1279_s21 = scalar_select %p31_p8, %s1166_s29, %s33_s19  }
  0x18   : > { %s1282_s22 = sand.u32 1, %s1166_s29   ;;  %s1452_s24 = sshll.u32 %s1170_s30, 2 }
  0x19   : > { %1462 = sst [smem:[#allocation17_spill]] %s1279_s21  ;;  %s1451_s23 = sshll.u32 %s1282_s22, 2 }
  0x1a   : > { %p1286_p13 = pnand %p903_p11, %p42_p12  ;;  %s314_s26 = sand.u32 1, %s1170_s30  }
  0x1b   : > { %s1464_s1 = sld [smem:[#allocation18_spill]]  ;;  %s318_s15 = scalar_lea.vmem [#allocation4], %s1451_s23 }
  0x1c   : > { %s326_s16 = sshll.u32 %s318_s15, 4  ;;  %s1298_s19 = scalar_lea.sflag [#allocation5], %s314_s26  ;;  %s327_s16 = int_to_ptr.vmem [resolvable:$true] %s326_s16 }
  0x1d   : > { %p978_p2 = pneg %p1286_p13 }
  0x21   : > { %s322_s12 = scalar_lea.hbm %s1464_s1, %s1452_s24 }
  0x22   : > { %s324_s13 = sshll.u32 %s322_s12, 4  ;;  %s981_s12 = scalar_lea.hbm %s1464_s1, 8  ;;  %s325_s13 = int_to_ptr.hbm [resolvable:$true] %s324_s13 }
  0x23   : > { %s974_s20 = sshra.s32 %s325_s13, 4  ;;  %s975_s20 = int_to_ptr.hbm [resolvable:$true] %s974_s20 }
  0x24   : > { %s976_s3 = scalar_lea.hbm %s975_s20, 4  ;;  %p982_p8 = scmp.lt.s32.totalorder %s975_s20, %s1464_s1 }
  0x25   : > { %p977_p0 = scmp.ne.s32.totalorder %s975_s20, %s976_s3  ;;  %p983_p9 = scmp.lt.s32.totalorder %s981_s12, %s976_s3 }
  0x27   : > { %p979_p3 = pnand %p978_p2, %p977_p0  ;;  %p984_p10 = por %p983_p9, %p982_p8 }
  0x29   : > { %p980_p6 = pneg %p979_p3 }
  0x2b   : > { %p985_p11 = pnand %p984_p10, %p980_p6 }
  0x2d   : > { %988 = shalt.err (!%p985_p11)
}
  0x2e   : > { %896 = dma.hbm_to_vmem [thread:$0]  (!%p1286_p13), %s325_s13, 64, %s327_s16, %s1298_s19  }
  0x2f   : > { %s1465_s4 = sld [smem:[#allocation20_spill]]  ;;  %s1173_s11 = smov [#allocation9]  }
  0x30   : > { %s266_s23 = sshll.u32 %s1173_s11, 4  ;;  %s279_s12 = sshll.u32 %s1448_s6, 4  ;;  %s267_s23 = int_to_ptr.vmem [resolvable:$true] %s266_s23  ;;  %s280_s12 = int_to_ptr.hbm [resolvable:$true] %s279_s12 }
  0x31   : > { %s1174_s15 = smov [#allocation10]   ;;  %s1466_s24 = sshll.u32 %s1170_s30, 2 }
  0x32   : > { %s281_s13 = sshll.u32 %s1174_s15, 4  ;;  %s303_s11 = scalar_lea.hbm %s1442_s0, %s1466_s24  ;;  %s282_s13 = int_to_ptr.vmem [resolvable:$true] %s281_s13 }
  0x33   : > { %889 = dma.hbm_to_vmem [thread:$0]  (!%p1262_p7), %s280_s12, 64, %s282_s13, [#allocation11]  }
  0x34   : > { %s1467_s1 = sshll.u32 %s1282_s22, 2  ;;  %s305_s29 = sshll.u32 %s303_s11, 4  ;;  %s306_s29 = int_to_ptr.hbm [resolvable:$true] %s305_s29 }
  0x35   : > { %s264_s27 = sshll.u32 %s1465_s4, 4  ;;  %s299_s4 = scalar_lea.vmem [#allocation2], %s1467_s1  ;;  %s265_s27 = int_to_ptr.hbm [resolvable:$true] %s264_s27 }
  0x36   : > { %886 = dma.hbm_to_vmem [thread:$0]  (!%p1262_p7), %s265_s27, 256, %s267_s23, [#allocation8]  }
  0x37   : > { %s307_s21 = sshll.u32 %s299_s4, 4  ;;  %s858_s3 = smul.u32 10, %s1282_s22  ;;  %s308_s21 = int_to_ptr.vmem [resolvable:$true] %s307_s21 }
  0x38   : > { %s296_s27 = scalar_lea.sflag [#allocation3], %s1282_s22  ;;  %s1064_s23 = sshra.s32 %s306_s29, 4  ;;  %s1065_s23 = int_to_ptr.hbm [resolvable:$true] %s1064_s23 }
  0x39   : > { %s1066_s20 = scalar_lea.hbm %s1065_s23, 4  ;;  %s1071_s15 = scalar_lea.hbm %s1442_s0, 8 }
  0x3a   : > { %p1067_p12 = scmp.ne.s32.totalorder %s1065_s23, %s1066_s20  ;;  %p1072_p3 = scmp.lt.s32.totalorder %s1065_s23, %s1442_s0 }
  0x3b   : > { %p1073_p6 = scmp.lt.s32.totalorder %s1071_s15, %s1066_s20 }
  0x3c   : > { %p1069_p7 = pnand %p1067_p12, %p978_p2 }
  0x3d   : > { %p1074_p8 = por %p1073_p6, %p1072_p3 }
  0x3e   : > { %p1070_p0 = pneg %p1069_p7 }
  0x40   : > { %p1075_p9 = pnand %p1074_p8, %p1070_p0 }
  0x42   : > { %1078 = shalt.err (!%p1075_p9)
}
  0x43   : > { %893 = dma.hbm_to_vmem [thread:$0]  (!%p1286_p13), %s306_s29, 64, %s308_s21, %s296_s27  }
  0x44   : > { %s859_s4 = smul.u32 10, %s1170_s30  ;;  %s337_s22 = scalar_lea.vmem [#allocation6], %s858_s3 }
  0x45   : > { %s346_s24 = sshll.u32 %s337_s22, 4  ;;  %s1101_s30 = scalar_lea.hbm %s1444_s2, 20  ;;  %s347_s24 = int_to_ptr.vmem [resolvable:$true] %s346_s24 }
  0x46   : > { %s342_s11 = scalar_lea.hbm %s1444_s2, %s859_s4 }
  0x47   : > { %s344_s17 = sshll.u32 %s342_s11, 4  ;;  %s345_s17 = int_to_ptr.hbm [resolvable:$true] %s344_s17 }
  0x48   : > { %s1094_s23 = sshra.s32 %s345_s17, 4  ;;  %s1095_s23 = int_to_ptr.hbm [resolvable:$true] %s1094_s23 }
  0x49   : > { %s1096_s20 = scalar_lea.hbm %s1095_s23, 10  ;;  %p1102_p7 = scmp.lt.s32.totalorder %s1095_s23, %s1444_s2 }
  0x4a   : > { %p1097_p10 = scmp.ne.s32.totalorder %s1095_s23, %s1096_s20  ;;  %p1103_p0 = scmp.lt.s32.totalorder %s1101_s30, %s1096_s20 }
  0x4c   : > { %p1099_p11 = pnand %p1097_p10, %p978_p2  ;;  %p1104_p3 = por %p1103_p0, %p1102_p7 }
  0x4e   : > { %p1100_p12 = pneg %p1099_p11 }
  0x50   : > { %p1105_p6 = pnand %p1104_p3, %p1100_p12 }
  0x52   : > { %1108 = shalt.err (!%p1105_p6)
}
  0x53   : > { %899 = dma.hbm_to_vmem [thread:$0]  (!%p1286_p13), %s345_s17, 160, %s347_s24, %s1298_s19  }
  0x54   : > { %355 = sbr.rel (%p1254_p5) target bundleno = 429 (0x1ad), region = 52  ;;  %s357_s27 = sand.u32 (!%p1254_p5), 1, %s1162_s28  }
  0x55   : > { %s845_s15 = sshll.u32 (!%p1254_p5), %s357_s27, 2  ;;  %s358_s13 = scalar_lea.sflag (!%p1254_p5), [#allocation3], %s357_s27 }
  0x56   : > { %s361_s1 = scalar_lea.vmem (!%p1254_p5), [#allocation2], %s845_s15 }
  0x59   : > { %1141 = dma.done.wait (%p1247_p4), %s358_s13, 64  }
  0x5a   : > { %1143 = vsyncadd (%p1247_p4), %s358_s13, 4294967232  ;;  %s367_s4 = sand.u32 1, %s1239_s9   ;;  %s371_s22 = scalar_lea.vmem [#allocation4], %s845_s15 }
  0x5b   : > { %s368_s25 = scalar_lea.sflag [#allocation5], %s367_s4 }
  0x5c   : > { %1145 = dma.done.wait (%p1247_p4), %s368_s25, 224  }
  0x5d   : > { %1147 = vsyncadd (%p1247_p4), %s368_s25, 4294967072  ;;  %s860_s14 = smul.u32 10, %s357_s27 }
  0x5f   : > { %s1372_s19 = scalar_lea.vmem [#allocation6], %s860_s14 }
  0x60   : > { %1149 = dma.done.wait (%p47_p1), [#allocation8], 336  }
  0x61   : > { %1151 = vsyncadd (%p47_p1), [#allocation8], 4294966960 }
  0x62   : > { %1153 = dma.done.wait (%p47_p1), [#allocation11], 64  }
  0x63   : > { %1155 = vsyncadd (%p47_p1), [#allocation11], 4294967232  ;;  %v486_v0 = vld [vmem:[%s361_s1] sm:$0xf]  ;;  %v446_v1 = vld [vmem:[#allocation9] sm:$0xff]  ;;  %vm526_vm0 = vcmask 1043456   ;;  %v452_v19 = vlaneseq }
  0x64   : > { %496 = vxpose.xlu0.c.b16.start.end [1/1] (short) (narrow) %v486_v0, 16  ;;  %v514_v2 = vunpack.c.l.b16 %v446_v1  ;;  %v515_v3 = vunpack.c.h.b16 %v446_v1  ;;  %v447_v4 = vld [vmem:[#allocation9 + $0x8] sm:$0xff]  ;;  %v595_v15 = vld [vmem:[%s371_s22] sm:$0xf]  ;;  %v448_v16 = vld [vmem:[#allocation10] sm:$0xf] }
  0x65   : > { %v516_v5 = vunpack.c.l.b16 %v447_v4  ;;  %v517_v6 = vunpack.c.h.b16 %v447_v4  ;;  %v619_v17 = vsel %vm526_vm0, %v448_v16, 0  ;;  %p440_p1 = scmp.lt.s32.totalorder %s1239_s9, 1  ;;  %v451_v18 = vld [vmem:[#allocation7] sm:$0x1f]  ;;  %v458_v20 = vld [vmem:[%s1372_s19] sm:$0xff]  ;;  %vm454_vm1 = vcmp.lt.s32.totalorder %v452_v19, 576 }
  0x66   : > { %v518_v7 = vpack.c.b16 %v514_v2, %v514_v2  ;;  %v519_v8 = vpack.c.b16 %v515_v3, %v515_v3  ;;  %v459_v21 = vld [vmem:[%s1372_s19 + $0x8] sm:$0x3]  ;;  %462 = vst [vmem:[#allocation1] ss:$4 sm:$0xff] %v458_v20  ;;  %vm522_vm2 = vcmask 64512   ;;  %vm484_vm3 = vcmask 518145  }
  0x67   : > { %v520_v9 = vpack.c.b16 %v516_v5, %v516_v5  ;;  %v521_v10 = vpack.c.b16 %v517_v6, %v517_v6  ;;  %s1474_s9 = smov (!%p440_p1, %s1239_s9), 1  ;;  %464 = vst [vmem:[#allocation1 + $0x20] ss:$4 sm:$0xff] %v459_v21  ;;  %v449_v34 = vld [vmem:[%s1447_s5] sm:$0xf]  ;;  %vm643_vm4 = vcmask 1040384  }
  0x68   : > { %v528_v11 = vsel %vm526_vm0, %v518_v7, 0  ;;  %v531_v12 = vsel %vm526_vm0, %v519_v8, 0  ;;  %s861_s10 = smul.u32 120, %s1474_s9  ;;  %v488_v35 = vperm.slane %v449_v34, 0  ;;  %v489_v36 = vperm.slane %v449_v34, 1 }
  0x69   : > { %546 = vmatpush.bf16.msra.mxu0 %v528_v11  ;;  %560 = vmatpush.bf16.msra.mxu1 %v531_v12  ;;  %v534_v13 = vsel %vm526_vm0, %v520_v9, 0  ;;  %v537_v14 = vsel %vm526_vm0, %v521_v10, 0  ;;  %v490_v43 = vperm.slane %v449_v34, 2  ;;  %v491_v44 = vperm.slane %v449_v34, 3  ;;  %v943_v59 = vld [vmem:[%s1449_s7] ss:$0 sm:$0xff] }
  0x6a   : > { %574 = vmatpush.bf16.msra.mxu2 %v534_v13  ;;  %588 = vmatpush.bf16.msra.mxu3 %v537_v14  ;;  %s1394_s26 = scalar_lea.vmem %s1450_s8, %s861_s10  ;;  %vm688_vm5 = vcmask 523265   ;;  %vm692_vm6 = vcmask 516096   ;;  %vm690_vm7 = vcmask 523264  }
  0x6b   : > { %456 = vst.msk [vmem:[%s1394_s26] ss:$8 sm:$0xf] %vm454_vm1, %v451_v18 }
  0x6c   : > { %457 = vst.msk [vmem:[%s1394_s26] ss:$8 sm:$0x10] %vm454_vm1, %v451_v18 }
  0x6d   : > { %628 = vmatpush.bf16.msrb.mxu0 %v619_v17  ;;  %v465_v22 = vld.sshfl [vmem:[#allocation1] sm:$0xff pattern:$0x73625140]  ;;  %v466_v23 = vld.sshfl [vmem:[#allocation1 + $0x8] sm:$0xff pattern:$0x73625140] }
  0x6e   : > { %v467_v24 = vld.sshfl [vmem:[#allocation1 + $0x10] sm:$0xff pattern:$0x73625140]  ;;  %v468_v25 = vld.sshfl [vmem:[#allocation1 + $0x18] sm:$0xff pattern:$0x73625140] }
  0x6f   : > { %v469_v26 = vld.sshfl [vmem:[#allocation1 + $0x20] sm:$0xff pattern:$0x73625140]  ;;  %v470_v27 = vrot.slane %v465_v22, 7  ;;  %v471_v28 = vrot.slane %v466_v23, 7  ;;  %v472_v29 = vrot.slane %v467_v24, 7 }
  0x70   : > { %v473_v30 = vrot.slane %v468_v25, 7  ;;  %v474_v31 = vrot.slane %v469_v26, 7 }
  0x71   : > { %480 = vst [vmem:[%s1394_s26 + $0x50] sm:$0x6] %v470_v27 }
  0x72   : > { %481 = vst [vmem:[%s1394_s26 + $0x58] sm:$0x6] %v471_v28 }
  0x73   : > { %482 = vst [vmem:[%s1394_s26 + $0x60] sm:$0x6] %v472_v29 }
  0x74   : > { %599 = vxpose.xlu0.c.b16.start.end [1/1] (short) (narrow) %v595_v15, 16  ;;  %483 = vst [vmem:[%s1394_s26 + $0x68] sm:$0x6] %v473_v30 }
  0x75   : > { %485 = vst.msk [vmem:[%s1394_s26 + $0x70] sm:$0x6] %vm484_vm3, %v474_v31 }
 0x110   : > { %v504_v32 = vpop.trf.xlu0 }
 0x111   : > { %851 = vmatmul.msk.bf16.vlgmr.msra.gmra.mxu0 %vm522_vm2, %v504_v32  ;;  %852 = vmatmul.msk.bf16.vlgmr.msra.gmra.mxu1 %vm522_vm2, %v504_v32 }
 0x112   : > { %853 = vmatmul.msk.bf16.vlgmr.msra.gmra.mxu2 %vm522_vm2, %v504_v32  ;;  %854 = vmatmul.msk.bf16.vlgmr.msra.gmra.mxu3 %vm522_vm2, %v504_v32 }
 0x120   : > { %v607_v33 = vpop.trf.xlu0 }
 0x121   : > { %855 = vmatmul.msk.bf16.vlgmr.msrb.gmra.mxu0 %vm522_vm2, %v607_v33 }
 0x18e   : > { %v548_v37 = vpop.f32.mrf.mxu0  ;;  %v562_v38 = vpop.f32.mrf.mxu1 }
 0x18f   : > { %v549_v39 = vadd.f32 %v548_v37, %v488_v35  ;;  %v563_v40 = vadd.f32 %v562_v38, %v489_v36 }
 0x191   : > { %v644_v41 = vrot.slane %v549_v39, 7  ;;  %v645_v42 = vrot.slane %v563_v40, 7 }
 0x193   : > { %668 = vst [vmem:[%s1394_s26] sm:$0xfe] %v644_v41 }
 0x194   : > { %669 = vst [vmem:[%s1394_s26 + $0x8] sm:$0xfe] %v645_v42 }
 0x195   : > { %v576_v45 = vpop.f32.mrf.mxu2  ;;  %v590_v46 = vpop.f32.mrf.mxu3 }
 0x196   : > { %v577_v47 = vadd.f32 %v576_v45, %v490_v43  ;;  %v591_v48 = vadd.f32 %v590_v46, %v491_v44  ;;  %v550_v49 = vpop.f32.mrf.mxu0  ;;  %v564_v50 = vpop.f32.mrf.mxu1 }
 0x197   : > { %v551_v51 = vadd.f32 %v550_v49, %v488_v35  ;;  %v565_v52 = vadd.f32 %v564_v50, %v489_v36 }
 0x198   : > { %v646_v53 = vrot.slane %v577_v47, 7  ;;  %v647_v54 = vrot.slane %v591_v48, 7 }
 0x199   : > { %v648_v55 = vrot.slane %v551_v51, 7  ;;  %v650_v56 = vrot.slane %v565_v52, 7 }
 0x19a   : > { %670 = vst [vmem:[%s1394_s26 + $0x10] sm:$0xfe] %v646_v53 }
 0x19b   : > { %671 = vst [vmem:[%s1394_s26 + $0x18] sm:$0xfe] %v647_v54  ;;  %v649_v57 = vsel %vm643_vm4, %v644_v41, %v648_v55  ;;  %v651_v58 = vsel %vm643_vm4, %v645_v42, %v650_v56 }
 0x19c   : > { %672 = vst [vmem:[%s1394_s26 + $0x28] sm:$0xff] %v649_v57 }
 0x19d   : > { %676 = vst [vmem:[%s1394_s26 + $0x50] sm:$0x1] %v648_v55  ;;  %v578_v60 = vpop.f32.mrf.mxu2  ;;  %v592_v61 = vpop.f32.mrf.mxu3 }
 0x19e   : > { %673 = vst [vmem:[%s1394_s26 + $0x30] sm:$0xff] %v651_v58  ;;  %v579_v62 = vadd.f32 %v578_v60, %v490_v43  ;;  %v593_v63 = vadd.f32 %v592_v61, %v491_v44  ;;  %v630_v0 = vpop.f32.mrf.mxu0 }
 0x19f   : > { %677 = vst [vmem:[%s1394_s26 + $0x58] sm:$0x1] %v650_v56  ;;  %v631_v1 = vadd.f32 %v943_v59, %v630_v0 }
 0x1a0   : > { %v652_v2 = vrot.slane %v579_v62, 7  ;;  %v654_v3 = vrot.slane %v593_v63, 7 }
 0x1a1   : > { %v682_v6 = vrot.slane %v631_v1, 7 }
 0x1a2   : > { %v653_v4 = vsel %vm643_vm4, %v646_v53, %v652_v2  ;;  %678 = vst [vmem:[%s1394_s26 + $0x60] sm:$0x1] %v652_v2  ;;  %v655_v5 = vsel %vm643_vm4, %v647_v54, %v654_v3 }
 0x1a3   : > { %674 = vst [vmem:[%s1394_s26 + $0x38] sm:$0xff] %v653_v4 }
 0x1a4   : > { %675 = vst [vmem:[%s1394_s26 + $0x40] sm:$0xff] %v655_v5 }
 0x1a5   : > { %679 = vst [vmem:[%s1394_s26 + $0x68] sm:$0x1] %v654_v3 }
 0x1a6   : > { %689 = vst.msk [vmem:[%s1394_s26 + $0x20] sm:$0xfe] %vm688_vm5, %v682_v6  ;;  %v632_v7 = vpop.f32.mrf.mxu0 }
 0x1a7   : > { %v633_v8 = vadd.f32 %v943_v59, %v632_v7 }
 0x1a9   : > { %v683_v9 = vrot.slane %v633_v8, 7 }
 0x1ab   : > { %v684_v10 = vsel %vm643_vm4, %v682_v6, %v683_v9  ;;  %693 = vst.msk [vmem:[%s1394_s26 + $0x70] sm:$0x1] %vm692_vm6, %v683_v9 }
 0x1ac   : > { %691 = vst.msk [vmem:[%s1394_s26 + $0x48] sm:$0xff] %vm690_vm7, %v684_v10 }
 0x1ad PF: > { %s1468_s20 = sld [smem:[#allocation16_spill]]  ;;  %p23_p4 = scmp.ge.s32.totalorder %s1267_s18, 4  }
 0x1ae   : > { %s1469_s29 = sld [smem:[#allocation17_spill]]  ;;  %s1470_s27 = smov %s1162_s28 }
 0x1af   : > { %s1472_s30 = smov %s1267_s18  ;;  %25 = sbr.rel (!%p23_p4) target bundleno = 11 (0xb), region = 129 }
 0x1b3   : > { %s1471_s28 = smov %s1468_s20 }
 0x1b4   :  { %715 = vsyncpa [#allocation3], 1 }
 0x1b5   :  { %717 = vsyncpa [#allocation3 + $0x1], 1 }
 0x1b6   :  { %718 = vsyncpa [#allocation5], 1 }
 0x1b7   :  { %720 = vsyncpa [#allocation5 + $0x1], 1 }
 0x1b8   :  { %721 = vsyncpa [#allocation8], 1 }
 0x1b9   :  { %722 = vsyncpa [#allocation11], 1 }

</bundles_post_ra>
